<compile_context>
chip_gen: v6e
topology: v6e:2x2x1
jax: 0.10.0
libtpu: 0.0.40
codegen_flags: <defaults>
</compile_context>

<pallas_src>
import functools

import jax
import jax.numpy as jnp
from jax.experimental import pallas as pl
from jax.experimental.pallas import tpu as pltpu

LANE = 128
SUBLANE = 8
NEG_INF_BIAS = -1e30  # padded output-lane bias -> exp underflows to exactly 0


def _round_up(x, m):
    return ((x + m - 1) // m) * m


def dqn_kernel(x_ref, w1_ref, b1_ref, w2_ref, b2_ref, o_ref):
    # --- hidden layer: Linear + ReLU (bf16 MXU matmul, f32 accumulate) ---
    x = x_ref[...]                                               # (TB, inp) bf16
    h = jnp.dot(x, w1_ref[...], preferred_element_type=jnp.float32) + b1_ref[...]
    h = jnp.maximum(h, 0.0)                                      # f32 ReLU (VPU)

    # --- dropout ---
    # TODO(synk): training-mode dropout (pltpu.prng_seed + prng_random_bits
    # mask) not wired; this kernel implements the eval-mode (identity) path,
    # which is what module.forward() computes under model.eval().

    # --- output layer: Linear (bf16 operands, f32 accumulate) ---
    logits = jnp.dot(h.astype(jnp.bfloat16), w2_ref[...],
                     preferred_element_type=jnp.float32) + b2_ref[...]

    # --- numerically-stable softmax over the 128-lane axis.  Padded lanes
    #     carry a -1e30 bias, so they never win the max and their exp is 0. ---
    m = jnp.max(logits, axis=-1, keepdims=True)
    e = jnp.exp(logits - m)                                      # EUP
    denom = jnp.sum(e, axis=-1, keepdims=True)                   # XLU
    o_ref[...] = (e * pl.reciprocal(denom, approx=True)).astype(o_ref.dtype)


def prepare_params(w1, b1, w2, b2):
    """One-time prep (hoisted out of the forward hot path).

    Transposes weights to (in, out), pads hidden / output dims to the 128-lane
    width, casts matmul operands to bf16 and keeps biases in f32.  Padded
    output lanes get a finite -1e30 bias so they vanish under softmax.
    """
    hid, inp = w1.shape
    out = w2.shape[0]
    hid_p = _round_up(hid, LANE)
    out_p = _round_up(out, LANE)

    w1_t = jnp.zeros((inp, hid_p), jnp.bfloat16)
    w1_t = w1_t.at[:, :hid].set(jnp.asarray(w1, jnp.float32).T.astype(jnp.bfloat16))
    b1_p = jnp.zeros((1, hid_p), jnp.float32)
    b1_p = b1_p.at[:, :hid].set(jnp.asarray(b1, jnp.float32)[None, :])

    w2_t = jnp.zeros((hid_p, out_p), jnp.bfloat16)
    w2_t = w2_t.at[:hid, :out].set(jnp.asarray(w2, jnp.float32).T.astype(jnp.bfloat16))
    b2_p = jnp.full((1, out_p), NEG_INF_BIAS, jnp.float32)
    b2_p = b2_p.at[:, :out].set(jnp.asarray(b2, jnp.float32)[None, :])

    return (w1_t, b1_p, w2_t, b2_p), out


@functools.partial(jax.jit, static_argnames=("out_size", "max_tile_b"))
def basic_dqn_forward(x, params, *, out_size, max_tile_b=512):
    """x: (B, inp) any float dtype; params from prepare_params."""
    w1_t, b1_p, w2_t, b2_p = params
    B, inp = x.shape
    hid_p = w1_t.shape[1]
    out_p = w2_t.shape[1]

    # Batch tiling: big sublane-aligned tiles (>=512 rows hits the DMA/grid
    # overhead sweet spot), padded batch so the grid divides evenly.
    tile_b = min(max_tile_b, _round_up(B, SUBLANE))
    b_pad = _round_up(B, tile_b)
    grid = (b_pad // tile_b,)

    x_p = jnp.zeros((b_pad, inp), jnp.bfloat16).at[:B, :].set(x.astype(jnp.bfloat16))

    # VMEM budget: double-buffered x + y blocks, resident weights/biases, 4x headroom.
    bytes_needed = (2 * tile_b * inp * 2          # x blocks (bf16, 2 buffers)
                    + 2 * tile_b * out_p * 4      # y blocks (f32, 2 buffers)
                    + inp * hid_p * 2 + hid_p * out_p * 2   # weights (bf16)
                    + hid_p * 4 + out_p * 4)                # biases (f32)
    vmem_limit = int(min(64 * 2**20, max(4 * 2**20, 4 * bytes_needed)))

    y_pad = pl.pallas_call(
        dqn_kernel,
        out_shape=jax.ShapeDtypeStruct((b_pad, out_p), jnp.float32),
        grid_spec=pltpu.PrefetchScalarGridSpec(
            num_scalar_prefetch=0,
            grid=grid,
            in_specs=[
                pl.BlockSpec((tile_b, inp), lambda i: (i, 0)),    # x:    tiled over batch
                pl.BlockSpec((inp, hid_p), lambda i: (0, 0)),     # W1^T: resident
                pl.BlockSpec((1, hid_p), lambda i: (0, 0)),       # b1:   resident
                pl.BlockSpec((hid_p, out_p), lambda i: (0, 0)),   # W2^T: resident
                pl.BlockSpec((1, out_p), lambda i: (0, 0)),       # b2:   resident
            ],
            out_specs=pl.BlockSpec((tile_b, out_p), lambda i: (i, 0)),
        ),
        compiler_params=pltpu.CompilerParams(
            dimension_semantics=("parallel",),
            vmem_limit_bytes=vmem_limit,
        ),
    )(x_p, w1_t, b1_p, w2_t, b2_p)

    return y_pad[:B, :out_size]


def init_params(key, inp_size, hid_size, out_size):
    """Deterministic init mimicking nn.Linear's U(-1/sqrt(fan_in), 1/sqrt(fan_in))."""
    k1, k2, k3, k4 = jax.random.split(key, 4)
    bound1 = 1.0 / (inp_size ** 0.5)
    bound2 = 1.0 / (hid_size ** 0.5)
    w1 = jax.random.uniform(k1, (hid_size, inp_size), jnp.float32, -bound1, bound1)
    b1 = jax.random.uniform(k2, (hid_size,), jnp.float32, -bound1, bound1)
    w2 = jax.random.uniform(k3, (out_size, hid_size), jnp.float32, -bound2, bound2)
    b2 = jax.random.uniform(k4, (out_size,), jnp.float32, -bound2, bound2)
    return w1, b1, w2, b2


def reference_forward(x, w1, b1, w2, b2):
    h = jnp.maximum(x @ w1.T + b1, 0.0)
    logits = h @ w2.T + b2
    return jax.nn.softmax(logits, axis=-1)


if __name__ == "__main__":
    key = jax.random.PRNGKey(0)
    kx, kp = jax.random.split(key)

    batch, inp_size, hid_size, out_size = 8, 32, 64, 16
    drop_prob = 0.1  # unused: eval-mode forward (Dropout == identity)

    x = jax.random.normal(kx, (batch, inp_size), jnp.float32)
    w1, b1, w2, b2 = init_params(kp, inp_size, hid_size, out_size)

    # One-time weight prep (transpose + pad + bf16 cast), outside the hot path.
    params, real_out = prepare_params(w1, b1, w2, b2)

    y = basic_dqn_forward(x, params, out_size=real_out)
    y = jax.block_until_ready(y)

    # sanity check against a pure-JAX f32 reference (bf16 operands => looser tol)
    y_ref = reference_forward(x, w1, b1, w2, b2)
    assert y.shape == (batch, out_size)
    assert jnp.allclose(y, y_ref, atol=2e-2, rtol=2e-2), "mismatch vs reference"
    assert jnp.allclose(jnp.sum(y, axis=-1), 1.0, atol=1e-2), "softmax rows must sum to ~1"

    print("KERNEL_OK")
</pallas_src>

<mosaic_0001>
module attributes {stable_mosaic.version = 11 : i64} {
  func.func @dqn_kernel(%arg0: i32, %arg1: memref<8x32xbf16, #tpu.memory_space<vmem>>, %arg2: memref<32x128xbf16, #tpu.memory_space<vmem>>, %arg3: memref<1x128xf32, #tpu.memory_space<vmem>>, %arg4: memref<128x128xbf16, #tpu.memory_space<vmem>>, %arg5: memref<1x128xf32, #tpu.memory_space<vmem>>, %arg6: memref<8x128xf32, #tpu.memory_space<vmem>>) attributes {dimension_semantics = [#tpu.dimension_semantics<parallel>], iteration_bounds = array<i64: 1>, scalar_prefetch = 0 : i64, scratch_operands = 0 : i64, tpu.core_type = #tpu.core_type<tc>, window_params = [{transform_indices = @transform_0, window_bounds = array<i64: 8, 32>}, {pipeline_mode = #tpu.pipeline_mode<synchronous>, transform_indices = @transform_1, window_bounds = array<i64: 32, 128>}, {pipeline_mode = #tpu.pipeline_mode<synchronous>, transform_indices = @transform_2, window_bounds = array<i64: 1, 128>}, {pipeline_mode = #tpu.pipeline_mode<synchronous>, transform_indices = @transform_3, window_bounds = array<i64: 128, 128>}, {pipeline_mode = #tpu.pipeline_mode<synchronous>, transform_indices = @transform_4, window_bounds = array<i64: 1, 128>}, {transform_indices = @transform_5, window_bounds = array<i64: 8, 128>}]} {
    %c0 = arith.constant 0 : index
    %c0_0 = arith.constant 0 : index
    %0 = vector.load %arg1[%c0, %c0_0] : memref<8x32xbf16, #tpu.memory_space<vmem>>, vector<8x32xbf16>
    %c0_1 = arith.constant 0 : index
    %c0_2 = arith.constant 0 : index
    %1 = vector.load %arg2[%c0_1, %c0_2] : memref<32x128xbf16, #tpu.memory_space<vmem>>, vector<32x128xbf16>
    %cst = arith.constant dense<0.000000e+00> : vector<8x128xf32>
    %2 = tpu.matmul %0, %1, %cst {dimension_numbers = #tpu.dot_dimension_numbers<[1], [0], [0], [1], [0, 0, 1, 1], [], []>} : vector<8x32xbf16>, vector<32x128xbf16>, vector<8x128xf32> -> vector<8x128xf32>
    %c0_3 = arith.constant 0 : index
    %c0_4 = arith.constant 0 : index
    %3 = vector.load %arg3[%c0_3, %c0_4] : memref<1x128xf32, #tpu.memory_space<vmem>>, vector<1x128xf32>
    %4 = vector.broadcast %3 : vector<1x128xf32> to vector<8x128xf32>
    %5 = arith.addf %2, %4 : vector<8x128xf32>
    %cst_5 = arith.constant 0.000000e+00 : f32
    %6 = vector.broadcast %cst_5 : f32 to vector<8x128xf32>
    %7 = arith.maximumf %5, %6 : vector<8x128xf32>
    %8 = arith.truncf %7 : vector<8x128xf32> to vector<8x128xbf16>
    %c0_6 = arith.constant 0 : index
    %c0_7 = arith.constant 0 : index
    %9 = vector.load %arg4[%c0_6, %c0_7] : memref<128x128xbf16, #tpu.memory_space<vmem>>, vector<128x128xbf16>
    %cst_8 = arith.constant dense<0.000000e+00> : vector<8x128xf32>
    %10 = tpu.matmul %8, %9, %cst_8 {dimension_numbers = #tpu.dot_dimension_numbers<[1], [0], [0], [1], [0, 0, 1, 1], [], []>} : vector<8x128xbf16>, vector<128x128xbf16>, vector<8x128xf32> -> vector<8x128xf32>
    %c0_9 = arith.constant 0 : index
    %c0_10 = arith.constant 0 : index
    %11 = vector.load %arg5[%c0_9, %c0_10] : memref<1x128xf32, #tpu.memory_space<vmem>>, vector<1x128xf32>
    %12 = vector.broadcast %11 : vector<1x128xf32> to vector<8x128xf32>
    %13 = arith.addf %10, %12 : vector<8x128xf32>
    %cst_11 = arith.constant dense<0xFF800000> : vector<8xf32>
    %14 = vector.multi_reduction <maximumf>, %13, %cst_11 [1] : vector<8x128xf32> to vector<8xf32>
    %15 = vector.shape_cast %14 : vector<8xf32> to vector<8x1xf32>
    %16 = vector.broadcast %15 : vector<8x1xf32> to vector<8x128xf32>
    %17 = arith.subf %13, %16 : vector<8x128xf32>
    %18 = math.exp %17 : vector<8x128xf32>
    %cst_12 = arith.constant dense<0.000000e+00> : vector<8xf32>
    %19 = vector.multi_reduction <add>, %18, %cst_12 [1] : vector<8x128xf32> to vector<8xf32>
    %20 = vector.shape_cast %19 : vector<8xf32> to vector<8x1xf32>
    %21 = tpu.reciprocal %20 {approx = true} : vector<8x1xf32> -> vector<8x1xf32>
    %22 = vector.broadcast %21 : vector<8x1xf32> to vector<8x128xf32>
    %23 = arith.mulf %18, %22 : vector<8x128xf32>
    %c0_13 = arith.constant 0 : index
    %c0_14 = arith.constant 0 : index
    %24 = vector.load %arg6[%c0_13, %c0_14] : memref<8x128xf32, #tpu.memory_space<vmem>>, vector<8x128xf32>
    tpu.vector_store %arg6[%c0_13, %c0_14], %23 {strides = array<i32>} : memref<8x128xf32, #tpu.memory_space<vmem>>, vector<8x128xf32>,
    return
  }
  func.func @transform_0(%arg0: i32) -> (i32, i32) {
    %c0_i32 = arith.constant 0 : i32
    %c0_i32_0 = arith.constant 0 : i32
    return %arg0, %c0_i32 : i32, i32
  }
  func.func @transform_1(%arg0: i32) -> (i32, i32) {
    %c0_i32 = arith.constant 0 : i32
    %c0_i32_0 = arith.constant 0 : i32
    %c0_i32_1 = arith.constant 0 : i32
    return %c0_i32, %c0_i32_0 : i32, i32
  }
  func.func @transform_2(%arg0: i32) -> (i32, i32) {
    %c0_i32 = arith.constant 0 : i32
    %c0_i32_0 = arith.constant 0 : i32
    %c0_i32_1 = arith.constant 0 : i32
    return %c0_i32, %c0_i32_0 : i32, i32
  }
  func.func @transform_3(%arg0: i32) -> (i32, i32) {
    %c0_i32 = arith.constant 0 : i32
    %c0_i32_0 = arith.constant 0 : i32
    %c0_i32_1 = arith.constant 0 : i32
    return %c0_i32, %c0_i32_0 : i32, i32
  }
  func.func @transform_4(%arg0: i32) -> (i32, i32) {
    %c0_i32 = arith.constant 0 : i32
    %c0_i32_0 = arith.constant 0 : i32
    %c0_i32_1 = arith.constant 0 : i32
    return %c0_i32, %c0_i32_0 : i32, i32
  }
  func.func @transform_5(%arg0: i32) -> (i32, i32) {
    %c0_i32 = arith.constant 0 : i32
    %c0_i32_0 = arith.constant 0 : i32
    return %arg0, %c0_i32 : i32, i32
  }
}

</mosaic_0001>

<bundles_post_ra>
// kernel: basic_dqn_forward.1
= control target key start
LH: loop header
LB: loop body
LE: loop exit
PB: predicated region body
PF: predicated region fallthrough
CT: control target
= control target key end

     0   :  { %10 = vsyncpa [#allocation3], 0  ;;  %s452_s0 = inlined_call_operand.vmem [shape: bf16[8,32], index: 0, kind: input, shape index: {}]   ;;  %s453_s1 = inlined_call_operand.hbm [shape: bf16[32,128], index: 1, kind: input, shape index: {}]   ;;  %s454_s2 = inlined_call_operand.vmem [shape: f32[1,128], index: 2, kind: input, shape index: {}]   ;;  %s455_s3 = inlined_call_operand.hbm [shape: bf16[128,128], index: 3, kind: input, shape index: {}]   ;;  %s456_s4 = inlined_call_operand.vmem [shape: f32[1,128], index: 4, kind: input, shape index: {}]   ;;  %s457_s5 = inlined_call_operand.hbm [shape: f32[8,128], index: 5, kind: output, shape index: {}]  }
   0x1   :  { %11 = vsyncpa [#allocation6], 0 }
   0x2   :  { %12 = vsyncpa [#allocation4], 0  ;;  %s397_s18 = smov [#allocation2]  }
   0x3   :  { %s20_s19 = sshll.u32 %s397_s18, 4  ;;  %s21_s19 = int_to_ptr.vmem [resolvable:$true] %s20_s19 }
   0x4   :  { %s339_s20 = scalar_lea.vmem %s21_s19, 256  ;;  %p344_p1 = scmp.lt.s32.totalorder %s21_s19, %s21_s19 }
   0x5   :  { %p340_p0 = scmp.ne.s32.totalorder %s21_s19, %s339_s20  ;;  %p345_p2 = scmp.lt.s32.totalorder %s339_s20, %s339_s20 }
   0x7   :  { %p346_p3 = por %p345_p2, %p344_p1 }
   0x9   :  { %p347_p4 = pnand %p346_p3, %p340_p0 }
   0xb   :  { %350 = shalt.err (!%p347_p4)
}
   0xc   :  { %s398_s21 = smov 64   ;;  %s399_s22 = smov 4  }
   0xd   :  { %26 = dma.hbm_to_vmem [thread:$0]  %s453_s1, 256, %s21_s19, [#allocation3], %s398_s21, %s398_s21, %s399_s22  }
   0xe   :  { %s400_s25 = smov [#allocation5]  }
   0xf   :  { %s34_s26 = sshll.u32 %s400_s25, 4  ;;  %s35_s26 = int_to_ptr.vmem [resolvable:$true] %s34_s26 }
  0x10   :  { %s359_s27 = scalar_lea.vmem %s35_s26, 1024  ;;  %p364_p6 = scmp.lt.s32.totalorder %s35_s26, %s35_s26 }
  0x11   :  { %p360_p5 = scmp.ne.s32.totalorder %s35_s26, %s359_s27  ;;  %p365_p7 = scmp.lt.s32.totalorder %s359_s27, %s359_s27 }
  0x13   :  { %p366_p8 = por %p365_p7, %p364_p6 }
  0x15   :  { %p367_p9 = pnand %p366_p8, %p360_p5 }
  0x17   :  { %370 = shalt.err (!%p367_p9)
}
  0x18   :  { %40 = dma.hbm_to_vmem [thread:$0]  %s455_s3, 1024, %s35_s26, [#allocation6], %s398_s21, %s398_s21, %s399_s22  }
  0x19   :  { %391 = dma.done.wait [#allocation3], 256  }
  0x1a   :  { %392 = vsyncadd [#allocation3], 4294967040 }
  0x1b   :  { %393 = dma.done.wait [#allocation6], 1024  }
  0x1c   :  { %394 = vsyncadd [#allocation6], 4294966272  ;;  %v401_v0 = vmov 0.0   ;;  %vm402_vm0 = vmmov 0   ;;  %v317_v1 = vld [vmem:[#allocation2 + $0x8] sm:$0xff]   ;;  %v318_v2 = vld [vmem:[#allocation2] sm:$0xff]  }
  0x1d   :  { %282 = vmatprep.subr.bf16.mxu0 %v401_v0  ;;  %286 = vmatprep.mubr.msk.bf16.mxu0 %vm402_vm0, %v401_v0  ;;  %v319_v3 = vld [vmem:[#allocation5 + $0x38] sm:$0xff]   ;;  %vm74_vm1 = vcmask 261120   ;;  %v320_v4 = vld [vmem:[#allocation5 + $0x30] sm:$0xff]   ;;  %v321_v6 = vld [vmem:[#allocation5 + $0x28] sm:$0xff]  }
  0x1e   :  { %290 = vmatprep.subr.bf16.mxu1 %v401_v0  ;;  %306 = vmatprep.mubr.msk.bf16.mxu1 %vm402_vm0, %v401_v0  ;;  %v50_v5 = vld [vmem:[%s452_s0] sm:$0xf]  ;;  %v322_v7 = vld [vmem:[#allocation5 + $0x20] sm:$0xff]   ;;  %v323_v8 = vld [vmem:[#allocation5 + $0x18] sm:$0xff]  }
  0x1f   :  { %283 = vmatpush3.bf16.msra.mxu0 %v317_v1  ;;  %291 = vmatpush3.bf16.msra.mxu1 %v319_v3  ;;  %v324_v9 = vld [vmem:[#allocation5 + $0x10] sm:$0xff]   ;;  %v325_v10 = vld [vmem:[#allocation5 + $0x8] sm:$0xff]   ;;  %v326_v11 = vld [vmem:[#allocation5] sm:$0xff]  }
  0x20   :  { %284 = vmatprep.subr.bf16.mxu0 %v401_v0  ;;  %292 = vmatprep.subr.bf16.mxu1 %v401_v0  ;;  %v257_v12 = vld [vmem:[%s454_s2] ss:$0 sm:$0xff]  ;;  %s403_s2 = smov [#allocation7]  }
  0x21   :  { %v261_v20 = vld [vmem:[%s456_s4] ss:$0 sm:$0xff]  ;;  %s247_s8 = sshll.u32 %s403_s2, 4  ;;  %s248_s8 = int_to_ptr.vmem [resolvable:$true] %s247_s8 }
  0x22   :  { %s371_s4 = scalar_lea.vmem %s248_s8, 128  ;;  %p376_p11 = scmp.lt.s32.totalorder %s248_s8, %s248_s8 }
  0x23   :  { %285 = vmatpush3.bf16.msra.mxu0 %v318_v2  ;;  %293 = vmatpush3.bf16.msra.mxu1 %v320_v4  ;;  %p372_p10 = scmp.ne.s32.totalorder %s248_s8, %s371_s4  ;;  %p377_p12 = scmp.lt.s32.totalorder %s371_s4, %s371_s4 }
  0x24   :  { %294 = vmatprep.subr.bf16.mxu1 %v401_v0 }
  0x25   :  { %p378_p13 = por %p377_p12, %p376_p11 }
  0x26   :  { %287 = vmatmul.mubr.msk.bf16.vlgmr.msra.gmra.mxu0 %vm74_vm1, %v50_v5 }
  0x27   :  { %295 = vmatpush3.bf16.msra.mxu1 %v321_v6  ;;  %p379_p0 = pnand %p378_p13, %p372_p10 }
  0x28   :  { %296 = vmatprep.subr.bf16.mxu1 %v401_v0 }
  0x2b   :  { %297 = vmatpush3.bf16.msra.mxu1 %v322_v7 }
  0x2c   :  { %298 = vmatprep.subr.bf16.mxu1 %v401_v0 }
  0x2f   :  { %299 = vmatpush3.bf16.msra.mxu1 %v323_v8 }
  0x30   :  { %300 = vmatprep.subr.bf16.mxu1 %v401_v0 }
  0x33   :  { %301 = vmatpush3.bf16.msra.mxu1 %v324_v9 }
  0x34   :  { %302 = vmatprep.subr.bf16.mxu1 %v401_v0 }
  0x37   :  { %303 = vmatpush3.bf16.msra.mxu1 %v325_v10 }
  0x38   :  { %304 = vmatprep.subr.bf16.mxu1 %v401_v0 }
  0x3b   :  { %305 = vmatpush3.bf16.msra.mxu1 %v326_v11 }
  0xe6   :  { %v112_v13 = vpop.f32.mrf.mxu0 }
  0xe7   :  { %v113_v14 = vadd.f32 %v257_v12, %v112_v13 }
  0xe8   :  { %v288_v15 = vpop.f32.mrf.mxu0 }
  0xe9   :  { %v118_v16 = vmax.f32 %v113_v14, 0.0 }
  0xea   :  { %v115_v17 = vpop.f32.mrf.mxu0 }
  0xeb   :  { %v119_v18 = vpack.c.bf16 %v118_v16, %v118_v16 }
  0xec   :  { %v289_v19 = vpop.f32.mrf.mxu0 }
  0xed   :  { %307 = vmatmul.mubr.bf16.vlgmr.msra.gmra.mxu1 %v119_v18 }
 0x1ad   :  { %v225_v21 = vpop.f32.mrf.mxu1 }
 0x1ae   :  { %v226_v22 = vadd.f32 %v261_v20, %v225_v21 }
 0x1af   :  { %v308_v23 = vpop.f32.mrf.mxu1 }
 0x1b0   :  { %231 = vmax.xlane.f32.xlu0 %v226_v22 }
 0x1b1   :  { %v228_v24 = vpop.f32.mrf.mxu1 }
 0x1b3   :  { %v309_v25 = vpop.f32.mrf.mxu1 }
 0x239   :  { %v232_v26 = vpop.xlane.xlu0 %231 }
 0x23a   :  { %v233_v27 = vsub.f32 %v226_v22, %v232_v26 }
 0x23c   :  { %v234_v28 = vmul.f32 1.442695, %v233_v27 }
 0x23e   :  { %327 = vpow2.f32 %v234_v28 }
 0x24b   :  { %v328_v29 = vpop.eup %327 }
 0x24c   :  { %236 = vadd.xlane.f32.xlu0 %v328_v29 }
 0x2d5   :  { %v237_v30 = vpop.xlane.xlu0 %236 }
 0x2d6   :  { %329 = vrcp.f32 %v237_v30 }
 0x2e3   :  { %v330_v31 = vpop.eup %329 }
 0x2e4   :  { %v239_v32 = vmul.f32 %v330_v31, %v328_v29 }
 0x2e6   :  { %240 = vst [vmem:[#allocation7] sm:$0xff] %v239_v32 }
 0x2e7   :  { %382 = shalt.err (!%p379_p0)
}
 0x2e8   :  { %250 = dma.vmem_to_hbm [thread:$0]  %s248_s8, 128, %s457_s5, [#allocation4]  }
 0x2e9   :  { %395 = dma.done.wait [#allocation4], 128  }
 0x2ea   :  { %396 = vsyncadd [#allocation4], 4294967168 }
 0x2eb   :  { %254 = vsyncpa [#allocation3], 1 }
 0x2ec   :  { %255 = vsyncpa [#allocation6], 1 }
 0x2ed   :  { %256 = vsyncpa [#allocation4], 1 }

</bundles_post_ra>
